<compile_context>
chip_gen: v7x
topology: tpu7x:2x2x1
jax: 0.10.0
libtpu: 0.0.40
codegen_flags: <defaults>
</compile_context>

<pallas_src>
import jax
import jax.numpy as jnp
from jax.experimental import pallas as pl
from jax.experimental.pallas import tpu as pltpu


# ---------------------------------------------------------------------------
# Kernels
# ---------------------------------------------------------------------------

def _spatial_attn_kernel(x_ref, o_ref):
    """Single-slab path. Block shape: (TB, C, HW)."""
    # Channel-sum / softmax path in f32. Only the (TB, 1, HW) logits/attn row
    # is kept live; x is re-read below so the full f32 copy is never resident
    # across both uses (reduces vreg pressure / spills for large C*HW blocks).
    s = jnp.sum(x_ref[...].astype(jnp.float32), axis=1, keepdims=True)   # (TB,1,HW)
    m = jnp.max(s, axis=-1, keepdims=True)                               # (TB,1,1)
    e = jnp.exp(s - m)                                                   # (TB,1,HW)
    denom = jnp.sum(e, axis=-1, keepdims=True)                           # (TB,1,1)
    attn = e * pl.reciprocal(denom, approx=True)                         # (TB,1,HW)

    x = x_ref[...]                                                       # re-read (streams)
    if x.dtype == jnp.bfloat16:
        # v6e/v7x: keep the dominant broadcast multiply in bf16 (native VPU).
        out = x * attn.astype(jnp.bfloat16)
    else:
        out = x.astype(jnp.float32) * attn
    o_ref[...] = out.astype(o_ref.dtype)


def _attn_map_kernel(x_ref, a_ref):
    """Fallback pass 1: per-HW-tile channel sum into a resident (1,1,HW) row;
    normalize (softmax) in place on the last tile.
    x block: (1, C, tHW); a block: (1, 1, HW), same block across the t axis."""
    t = pl.program_id(1)
    thw = x_ref.shape[-1]
    start = pl.multiple_of(t * thw, 128)

    a_ref[:, :, pl.ds(start, thw)] = jnp.sum(
        x_ref[...].astype(jnp.float32), axis=1, keepdims=True)           # (1,1,tHW)

    @pl.when(t == pl.num_programs(1) - 1)
    def _():
        logits = a_ref[...]                                              # (1,1,HW)
        m = jnp.max(logits, axis=-1, keepdims=True)
        e = jnp.exp(logits - m)
        denom = jnp.sum(e, axis=-1, keepdims=True)
        a_ref[...] = e * pl.reciprocal(denom, approx=True)


def _apply_attn_kernel(x_ref, a_ref, o_ref):
    """Fallback pass 2: lane-dense broadcast multiply per HW tile."""
    x = x_ref[...]                                                       # (1,C,tHW)
    attn = a_ref[...]                                                    # (1,1,tHW) f32
    if x.dtype == jnp.bfloat16:
        out = x * attn.astype(jnp.bfloat16)
    else:
        out = x.astype(jnp.float32) * attn
    o_ref[...] = out.astype(o_ref.dtype)


# ---------------------------------------------------------------------------
# Tiling helpers
# ---------------------------------------------------------------------------

def _pick_tb(batch, per_batch_bytes, target_block_bytes):
    """Largest TB dividing `batch` with TB*per_batch_bytes <= target, while
    keeping >= 2 grid steps when possible (so both v7x TensorCores get work)."""
    tb = max(1, min(batch, target_block_bytes // max(per_batch_bytes, 1)))
    if batch >= 2:
        tb = max(1, min(tb, batch // 2))
    while batch % tb:
        tb -= 1
    return tb


def _pick_hw_tile(hw, c, itemsize, tile_bytes):
    """Largest multiple of 128 that divides HW with C*tHW*itemsize <= tile_bytes."""
    best = None
    t = 128
    while t <= hw:
        if hw % t == 0 and c * t * itemsize <= tile_bytes:
            best = t
        t += 128
    return best


# ---------------------------------------------------------------------------
# pallas_call wrappers
# ---------------------------------------------------------------------------

def _spatial_attn_single_slab(x, target_block_bytes):
    B, C, HW = x.shape
    itemsize = x.dtype.itemsize
    per_batch = C * HW * itemsize
    tb = _pick_tb(B, per_batch, target_block_bytes)
    block_bytes = tb * per_batch
    # 2x double-buffer x (in + out) + headroom; clamp to stay safe on v7x (64 MiB).
    vmem_limit = int(min(48 << 20, max(32 << 20, 4 * block_bytes + (4 << 20))))

    return pl.pallas_call(
        _spatial_attn_kernel,
        out_shape=jax.ShapeDtypeStruct((B, C, HW), x.dtype),
        grid_spec=pltpu.PrefetchScalarGridSpec(
            num_scalar_prefetch=0,
            grid=(B // tb,),
            in_specs=[pl.BlockSpec((tb, C, HW), lambda i: (i, 0, 0))],
            out_specs=pl.BlockSpec((tb, C, HW), lambda i: (i, 0, 0)),
        ),
        compiler_params=pltpu.CompilerParams(
            dimension_semantics=("parallel",),
            vmem_limit_bytes=vmem_limit,
        ),
    )(x)


def _spatial_attn_two_pass(x, thw):
    B, C, HW = x.shape
    n_hw = HW // thw
    itemsize = x.dtype.itemsize
    tile_bytes = C * thw * itemsize
    vmem_limit = int(min(48 << 20,
                         max(32 << 20, 6 * tile_bytes + 8 * HW * 4 + (4 << 20))))

    # Pass 1: channel-sum + softmax -> attention row per batch, (B, 1, HW) f32.
    attn = pl.pallas_call(
        _attn_map_kernel,
        out_shape=jax.ShapeDtypeStruct((B, 1, HW), jnp.float32),
        grid_spec=pltpu.PrefetchScalarGridSpec(
            num_scalar_prefetch=0,
            grid=(B, n_hw),
            in_specs=[pl.BlockSpec((1, C, thw), lambda b, t: (b, 0, t))],
            out_specs=pl.BlockSpec((1, 1, HW), lambda b, t: (b, 0, 0)),
        ),
        compiler_params=pltpu.CompilerParams(
            dimension_semantics=("parallel", "arbitrary"),
            vmem_limit_bytes=vmem_limit,
        ),
    )(x)

    # Pass 2: broadcast multiply, HW-tiled and lane-dense.
    out = pl.pallas_call(
        _apply_attn_kernel,
        out_shape=jax.ShapeDtypeStruct((B, C, HW), x.dtype),
        grid_spec=pltpu.PrefetchScalarGridSpec(
            num_scalar_prefetch=0,
            grid=(B, n_hw),
            in_specs=[pl.BlockSpec((1, C, thw), lambda b, t: (b, 0, t)),
                      pl.BlockSpec((1, 1, thw), lambda b, t: (b, 0, t))],
            out_specs=pl.BlockSpec((1, C, thw), lambda b, t: (b, 0, t)),
        ),
        compiler_params=pltpu.CompilerParams(
            dimension_semantics=("parallel", "parallel"),
            vmem_limit_bytes=vmem_limit,
        ),
    )(x, attn)
    return out


def spatial_attn(inputs, *, target_block_bytes=2 << 20,
                 single_slab_max_bytes=8 << 20, hw_tile_bytes=4 << 20):
    """inputs: (B, C, H, W) array. Returns same shape/dtype."""
    B, C, H, W = inputs.shape
    HW = H * W
    itemsize = inputs.dtype.itemsize
    per_batch = C * HW * itemsize
    x = inputs.reshape(B, C, HW)

    if per_batch <= single_slab_max_bytes:
        out = _spatial_attn_single_slab(x, target_block_bytes)
    else:
        thw = _pick_hw_tile(HW, C, itemsize, hw_tile_bytes)
        if thw is None:
            # TODO(synk): add a channel-tiled fallback for HW not divisible by 128;
            # best-effort single slab with a raised VMEM limit for now.
            out = _spatial_attn_single_slab(x, target_block_bytes)
        else:
            out = _spatial_attn_two_pass(x, thw)

    return out.reshape(B, C, H, W)


# ---------------------------------------------------------------------------
# Reference + test
# ---------------------------------------------------------------------------

def _reference(inputs):
    # Pure-JAX reference mirroring the PyTorch forward.
    B, C, H, W = inputs.shape
    s = jnp.sum(inputs, axis=1).reshape(B, -1)
    a = jax.nn.softmax(s, axis=-1).reshape(B, 1, H, W)
    return inputs * a


if __name__ == "__main__":
    key = jax.random.PRNGKey(0)
    x = jax.random.normal(key, (2, 4, 16, 16), dtype=jnp.float32)
    ref = _reference(x)

    # Default (single-slab, TB-batched) path.
    out = spatial_attn(x)
    jax.block_until_ready(out)
    assert out.shape == x.shape and out.dtype == x.dtype
    assert jnp.allclose(out, ref, atol=2e-6, rtol=2e-3), \
        float(jnp.max(jnp.abs(out - ref)))

    # Force the two-pass HW-tiled fallback (tiny budgets) and check it too.
    out_fb = spatial_attn(x, single_slab_max_bytes=0, hw_tile_bytes=2048)
    jax.block_until_ready(out_fb)
    assert out_fb.shape == x.shape and out_fb.dtype == x.dtype
    assert jnp.allclose(out_fb, ref, atol=2e-6, rtol=2e-3), \
        float(jnp.max(jnp.abs(out_fb - ref)))

    print("KERNEL_OK")
</pallas_src>

<mosaic_0001>
module attributes {stable_mosaic.version = 11 : i64} {
  func.func @_spatial_attn_kernel(%arg0: i32, %arg1: memref<1x4x256xf32, #tpu.memory_space<vmem>>, %arg2: memref<1x4x256xf32, #tpu.memory_space<vmem>>) attributes {dimension_semantics = [#tpu.dimension_semantics<parallel>], iteration_bounds = array<i64: 2>, scalar_prefetch = 0 : i64, scratch_operands = 0 : i64, tpu.core_type = #tpu.core_type<tc>, window_params = [{transform_indices = @transform_0, window_bounds = array<i64: 1, 4, 256>}, {transform_indices = @transform_1, window_bounds = array<i64: 1, 4, 256>}]} {
    %c0 = arith.constant 0 : index
    %c0_0 = arith.constant 0 : index
    %c0_1 = arith.constant 0 : index
    %0 = vector.load %arg1[%c0, %c0_0, %c0_1] : memref<1x4x256xf32, #tpu.memory_space<vmem>>, vector<1x4x256xf32>
    %cst = arith.constant dense<0.000000e+00> : vector<1x256xf32>
    %1 = vector.multi_reduction <add>, %0, %cst [1] : vector<1x4x256xf32> to vector<1x256xf32>
    %2 = vector.shape_cast %1 : vector<1x256xf32> to vector<1x1x256xf32>
    %cst_2 = arith.constant dense<0xFF800000> : vector<1x1xf32>
    %3 = vector.multi_reduction <maximumf>, %2, %cst_2 [2] : vector<1x1x256xf32> to vector<1x1xf32>
    %4 = vector.shape_cast %3 : vector<1x1xf32> to vector<1x1x1xf32>
    %5 = vector.broadcast %4 : vector<1x1x1xf32> to vector<1x1x256xf32>
    %6 = arith.subf %2, %5 : vector<1x1x256xf32>
    %7 = math.exp %6 : vector<1x1x256xf32>
    %cst_3 = arith.constant dense<0.000000e+00> : vector<1x1xf32>
    %8 = vector.multi_reduction <add>, %7, %cst_3 [2] : vector<1x1x256xf32> to vector<1x1xf32>
    %9 = vector.shape_cast %8 : vector<1x1xf32> to vector<1x1x1xf32>
    %10 = tpu.reciprocal %9 {approx = true} : vector<1x1x1xf32> -> vector<1x1x1xf32>
    %11 = vector.broadcast %10 : vector<1x1x1xf32> to vector<1x1x256xf32>
    %12 = arith.mulf %7, %11 : vector<1x1x256xf32>
    %c0_4 = arith.constant 0 : index
    %c0_5 = arith.constant 0 : index
    %c0_6 = arith.constant 0 : index
    %13 = vector.load %arg1[%c0_4, %c0_5, %c0_6] : memref<1x4x256xf32, #tpu.memory_space<vmem>>, vector<1x4x256xf32>
    %14 = vector.broadcast %12 : vector<1x1x256xf32> to vector<1x4x256xf32>
    %15 = arith.mulf %13, %14 : vector<1x4x256xf32>
    %c0_7 = arith.constant 0 : index
    %c0_8 = arith.constant 0 : index
    %c0_9 = arith.constant 0 : index
    %16 = vector.load %arg2[%c0_7, %c0_8, %c0_9] : memref<1x4x256xf32, #tpu.memory_space<vmem>>, vector<1x4x256xf32>
    tpu.vector_store %arg2[%c0_7, %c0_8, %c0_9], %15 {strides = array<i32>} : memref<1x4x256xf32, #tpu.memory_space<vmem>>, vector<1x4x256xf32>,
    return
  }
  func.func @transform_0(%arg0: i32) -> (i32, i32, i32) {
    %c0_i32 = arith.constant 0 : i32
    %c0_i32_0 = arith.constant 0 : i32
    %c0_i32_1 = arith.constant 0 : i32
    return %arg0, %c0_i32, %c0_i32_0 : i32, i32, i32
  }
  func.func @transform_1(%arg0: i32) -> (i32, i32, i32) {
    %c0_i32 = arith.constant 0 : i32
    %c0_i32_0 = arith.constant 0 : i32
    %c0_i32_1 = arith.constant 0 : i32
    return %arg0, %c0_i32, %c0_i32_0 : i32, i32, i32
  }
}

</mosaic_0001>

<bundles_post_ra>
// kernel: tpu_custom_call.1
= control target key start
LH: loop header
LB: loop body
LE: loop exit
PB: predicated region body
PF: predicated region fallthrough
CT: control target
= control target key end

     0   :  { %6 = vsyncpa [#allocation3], 0  ;;  %s602_s0 = inlined_call_operand.hbm [shape: f32[2,4,256], index: 0, kind: input, shape index: {}]   ;;  %s603_s1 = inlined_call_operand.hbm [shape: f32[2,4,256], index: 1, kind: output, shape index: {}]  }
   0x1   :  { %8 = vsyncpa [#allocation3 + $0x1], 0 }
   0x2   :  { %9 = vsyncpa [#allocation4], 0 }
   0x3   :  { %11 = vsyncpa [#allocation4 + $0x1], 0  ;;  %s437_s6 = smov 0   ;;  %s439_s7 = smov 0  }
   0x4   :  { %s441_s8 = smov 0   ;;  %s443_s9 = smov 0  }
   0x5 LB: > { %s458_s10 = sadd.s32 4294967295, %s423_s9   ;;  %s258_s11 = sadd.s32 4294967294, %s423_s9   ;;  %s423_s9 = sphi %s443_s9, %s618_s9   ;;  %s419_s8 = sphi %s441_s8, %s617_s8   ;;  %s415_s7 = sphi %s439_s7, %s616_s7   ;;  %s411_s6 = sphi %s437_s6, %s615_s6  }
   0x6   : > { %s462_s12 = sadd.s32 1, %s423_s9   ;;  %s24_s13 = sadd.s32 1, %s419_s8 }
   0x7   : > { %s21_s14 = ssub.s32 %s423_s9, %s462_s12  ;;  %p31_p0 = scmp.ne.s32.totalorder %s419_s8, %s415_s7 }
   0x8   : > { %p22_p1 = scmp.eq.s32.totalorder %s21_s14, 0  ;;  %p32_p2 = scmp.eq.s32.totalorder %s423_s9, 0 }
   0x9   : > { %p37_p3 = scmp.ne.s32.totalorder %s415_s7, %s411_s6  ;;  %p38_p4 = scmp.eq.s32.totalorder %s458_s10, 0 }
   0xa   : > { %s474_s15 = scalar_select %p22_p1, %s419_s8, %s24_s13  }
   0xb   : > { %p476_p5 = por %p32_p2, %p31_p0  ;;  %p480_p6 = por %p38_p4, %p37_p3 }
   0xc   : > { %p61_p7 = scmp.eq.s32.totalorder %s458_s10, 1  ;;  %p67_p8 = scmp.eq.s32.totalorder %s258_s11, 1 }
   0xd   : > { %p286_p10 = scmp.lt.s32.totalorder %s423_s9, 2  ;;  %s87_s20 = sand.u32 1, %s419_s8  }
   0xe   : > { %p487_p11 = por %p61_p7, %p31_p0  ;;  %p491_p12 = por %p67_p8, %p37_p3 }
   0xf   : > { %s272_s21 = sshll.u32 %s423_s9, 7  ;;  %s261_s22 = sshll.u32 %s87_s20, 3 }
  0x10   : > { %s607_s18 = scalar_select %p487_p11, 1, 0 }
  0x11   : > { %s608_s19 = scalar_select %p491_p12, 1, 0 }
  0x12   : > { %s500_s25 = scalar_lea.hbm %s602_s0, %s272_s21  ;;  %s91_s26 = scalar_lea.vmem [#allocation2], %s261_s22 }
  0x13   : > { %s99_s27 = sshll.u32 %s91_s26, 4  ;;  %p504_p13 = pnand %p286_p10, %p476_p5  ;;  %s508_s27 = int_to_ptr.vmem [resolvable:$true] %s99_s27 }
  0x14   : > { %s88_s29 = scalar_lea.sflag [#allocation3], %s87_s20  ;;  %s327_s30 = scalar_lea.hbm %s500_s25, 128 }
  0x15   : > { %p328_p2 = scmp.ne.s32.totalorder %s500_s25, %s327_s30  ;;  %p329_p3 = pneg %p504_p13 }
  0x16   : > { %s332_s4 = scalar_lea.hbm %s602_s0, 256  ;;  %p333_p5 = scmp.lt.u32.totalorder %s500_s25, %s602_s0 }
  0x17   : > { %p330_p4 = pnand %p329_p3, %p328_p2  ;;  %p334_p8 = scmp.lt.u32.totalorder %s332_s4, %s327_s30 }
  0x18   : > { %p336_p9 = scmp.lt.u32.totalorder %s327_s30, %s500_s25 }
  0x19   : > { %p331_p7 = pneg %p330_p4  ;;  %p335_p10 = por %p334_p8, %p333_p5 }
  0x1b   : > { %p337_p0 = por %p336_p9, %p335_p10 }
  0x1d   : > { %p338_p1 = pnand %p337_p0, %p331_p7 }
  0x1f   : > { %341 = shalt.err (!%p338_p1)
}
  0x20   : > { %s342_s13 = scalar_lea.vmem %s508_s27, 128  ;;  %s425_s14 = smov [#allocation2]  }
  0x21   : > { %p343_p2 = scmp.ne.s32.totalorder %s508_s27, %s342_s13  ;;  %s347_s16 = sshll.u32 %s425_s14, 4  ;;  %s348_s16 = int_to_ptr.vmem [resolvable:$false] %s347_s16 }
  0x22   : > { %s349_s20 = scalar_lea.vmem %s348_s16, 256  ;;  %p350_p11 = scmp.lt.s32.totalorder %s508_s27, %s348_s16 }
  0x23   : > { %p345_p4 = pnand %p343_p2, %p329_p3  ;;  %p351_p5 = scmp.lt.s32.totalorder %s349_s20, %s342_s13 }
  0x25   : > { %p346_p12 = pneg %p345_p4  ;;  %p352_p8 = por %p351_p5, %p350_p11 }
  0x27   : > { %p353_p9 = pnand %p352_p8, %p346_p12 }
  0x29   : > { %356 = shalt.err (!%p353_p9)
}
  0x2a   : > { %281 = dma.hbm_to_vmem [thread:$0]  (!%p504_p13), %s500_s25, 128, %s508_s27, %s88_s29  }
  0x2b   : > { %p610_p0 = scmp.lt.s32.totalorder %s423_s9, 3  ;;  %p611_p1 = scmp.ge.s32.totalorder %s423_s9, 1 }
  0x2d   : > { %p105_p3 = pnand %p611_p1, %p610_p0 }
  0x2e   : > { %s542_s21 = sand.u32 (!%p105_p3), 1, %s415_s7  }
  0x2f   : > { %108 = sbr.rel (%p105_p3) target bundleno = 406 (0x196), region = 24  ;;  %s265_s22 = sshll.u32 (!%p105_p3), %s542_s21, 3 }
  0x30   : > { %s111_s23 = scalar_lea.sflag (!%p105_p3), [#allocation3], %s542_s21  ;;  %s114_s24 = scalar_lea.vmem (!%p105_p3), [#allocation2], %s265_s22 }
  0x36   : > { %402 = dma.done.wait (%p480_p6), %s111_s23, 128  }
  0x37   : > { %404 = vsyncadd (%p480_p6), %s111_s23, 4294967168  ;;  %vm137_vm0 = vcmask 1043456   ;;  %v133_v0 = vld [vmem:[%s114_s24] sm:$0xff]  ;;  %s273_s17 = sshll.u32 %s458_s10, 7  ;;  %s132_s25 = scalar_lea.vmem [#allocation5], %s265_s22 }
  0x38   : > { %v135_v1 = vcombine.high %v133_v0, %v133_v0  ;;  %v138_v2 = vsel %vm137_vm0, %v133_v0, 0.0  ;;  %s188_s26 = sshll.u32 %s132_s25, 4  ;;  %s558_s29 = scalar_lea.hbm %s603_s1, %s273_s17  ;;  %s560_s26 = int_to_ptr.vmem [resolvable:$true] %s188_s26 }
  0x39   : > { %v139_v3 = vrot.slane %v138_v2, 4  ;;  %s174_s30 = scalar_lea.sflag [#allocation4], %s542_s21  ;;  %s357_s2 = scalar_lea.vmem %s560_s26, 128 }
  0x3a   : > { %v145_v4 = vsel %vm137_vm0, %v135_v1, 0.0  ;;  %p358_p6 = scmp.ne.s32.totalorder %s560_s26, %s357_s2  ;;  %p612_p11 = scmp.ne.s32.totalorder %s607_s18, 0 }
  0x3b   : > { %v140_v5 = vadd.f32 %v139_v3, %v138_v2  ;;  %v146_v6 = vrot.slane %v145_v4, 4  ;;  %s426_s10 = smov [#allocation5]  }
  0x3c   : > { %p359_p12 = pnand %p358_p6, %p612_p11  ;;  %s361_s3 = sshll.u32 %s426_s10, 4  ;;  %s362_s3 = int_to_ptr.vmem [resolvable:$false] %s361_s3 }
  0x3d   : > { %v141_v7 = vrot.slane %v140_v5, 2  ;;  %v147_v8 = vadd.f32 %v146_v6, %v145_v4  ;;  %s363_s4 = scalar_lea.vmem %s362_s3, 256  ;;  %p364_p7 = scmp.lt.s32.totalorder %s560_s26, %s362_s3 }
  0x3e   : > { %p360_p13 = pneg %p359_p12  ;;  %p365_p10 = scmp.lt.s32.totalorder %s363_s4, %s357_s2 }
  0x3f   : > { %v142_v9 = vadd.f32 %v141_v7, %v140_v5  ;;  %v148_v10 = vrot.slane %v147_v8, 2 }
  0x40   : > { %p366_p2 = por %p365_p10, %p364_p7 }
  0x41   : > { %v143_v11 = vrot.slane %v142_v9, 1  ;;  %v149_v12 = vadd.f32 %v148_v10, %v147_v8 }
  0x42   : > { %p367_p4 = pnand %p366_p2, %p360_p13 }
  0x43   : > { %v144_v13 = vadd.f32 %v143_v11, %v142_v9  ;;  %v150_v14 = vrot.slane %v149_v12, 1 }
  0x45   : > { %v151_v15 = vadd.f32 %v150_v14, %v149_v12 }
  0x47   : > { %v152_v16 = vmax.f32 %v144_v13, %v151_v15 }
  0x49   : > { %153 = vmax.xlane.f32.xlu0 %v152_v16 }
  0xd6   : > { %v154_v17 = vpop.xlane.xlu0 %153 }
  0xd7   : > { %v155_v18 = vsub.f32 %v144_v13, %v154_v17  ;;  %v156_v19 = vsub.f32 %v151_v15, %v154_v17 }
  0xd9   : > { %v157_v20 = vmul.f32 1.442695, %v155_v18  ;;  %v159_v21 = vmul.f32 1.442695, %v156_v19 }
  0xdb   : > { %321 = vpow2.f32 %v157_v20 }
  0xdc   : > { %323 = vpow2.f32 %v159_v21 }
  0xe5   : > { %v322_v22 = vpop.eup %321 }
  0xe6   : > { %v324_v23 = vpop.eup %323 }
  0xe7   : > { %v161_v24 = vadd.f32 %v324_v23, %v322_v22 }
  0xe9   : > { %162 = vadd.xlane.f32.xlu0 %v161_v24 }
 0x176   : > { %v163_v25 = vpop.xlane.xlu0 %162 }
 0x177   : > { %325 = vrcp.f32 %v163_v25 }
 0x181   : > { %v326_v26 = vpop.eup %325 }
 0x182   : > { %v165_v27 = vmul.f32 %v326_v26, %v322_v22  ;;  %v166_v28 = vmul.f32 %v326_v26, %v324_v23 }
 0x184   : > { %v169_v29 = vcombine.low %v165_v27, %v166_v28 }
 0x186   : > { %v171_v30 = vmul.f32 %v169_v29, %v133_v0 }
 0x188   : > { %172 = vst [vmem:[%s132_s25] sm:$0xff] %v171_v30 }
 0x189   : > { %370 = shalt.err (!%p367_p4)
}
 0x18a   : > { %s371_s5 = scalar_lea.hbm %s558_s29, 128  ;;  %s375_s14 = scalar_lea.hbm %s603_s1, 256 }
 0x18b   : > { %p372_p5 = scmp.ne.s32.totalorder %s558_s29, %s371_s5  ;;  %p376_p0 = scmp.lt.u32.totalorder %s558_s29, %s603_s1 }
 0x18c   : > { %p377_p1 = scmp.lt.u32.totalorder %s375_s14, %s371_s5  ;;  %p379_p6 = scmp.lt.u32.totalorder %s371_s5, %s558_s29 }
 0x18d   : > { %p373_p8 = pnand %p372_p5, %p612_p11 }
 0x18e   : > { %p378_p3 = por %p377_p1, %p376_p0 }
 0x18f   : > { %p374_p9 = pneg %p373_p8 }
 0x190   : > { %p380_p12 = por %p379_p6, %p378_p3 }
 0x192   : > { %p381_p13 = pnand %p380_p12, %p374_p9 }
 0x194   : > { %384 = shalt.err (!%p381_p13)
}
 0x195   : > { %276 = dma.vmem_to_hbm [thread:$0]  (%p612_p11), %s560_s26, 128, %s558_s29, %s174_s30  }
 0x196 PF: > { %s200_s21 = sand.u32 1, %s411_s6   ;;  %p613_p7 = scmp.ne.s32.totalorder %s608_s19, 0 }
 0x197   : > { %p614_p10 = scmp.ge.s32.totalorder %s423_s9, 2  ;;  %s201_s22 = scalar_lea.sflag [#allocation4], %s200_s21 }
 0x199   : > { %p283_p2 = pnand %p614_p10, %p613_p7 }
 0x19b   : > { %406 = dma.done.wait (!%p283_p2), %s201_s22, 128  }
 0x19c   : > { %408 = vsyncadd (!%p283_p2), %s201_s22, 4294967168  ;;  %p14_p4 = scmp.ge.s32.totalorder %s462_s12, 4   ;;  %s615_s6 = smov %s415_s7 }
 0x19d   : > { %s616_s7 = smov %s419_s8  ;;  %s617_s8 = smov %s474_s15 }
 0x19e   : > { %s618_s9 = smov %s462_s12  ;;  %16 = sbr.rel (!%p14_p4) target bundleno = 5 (0x5), region = 69 }
 0x1a5   :  { %206 = vsyncpa [#allocation3], 1 }
 0x1a6   :  { %208 = vsyncpa [#allocation3 + $0x1], 1 }
 0x1a7   :  { %209 = vsyncpa [#allocation4], 1 }
 0x1a8   :  { %211 = vsyncpa [#allocation4 + $0x1], 1 }

</bundles_post_ra>
